<compile_context>
chip_gen: v5e
topology: v5e:2x2
jax: 0.10.0
libtpu: 0.0.40
codegen_flags: <defaults>
</compile_context>

<pallas_src>
import functools

import jax
import jax.numpy as jnp
from jax.experimental import pallas as pl
from jax.experimental.pallas import tpu as pltpu


# Conservative per-step VMEM working-set budget (bytes), including the double
# buffering Pallas adds for pipelining. Fits every generation's default scoped
# VMEM limit, so no vmem_limit_bytes override is needed.
_VMEM_BUDGET = 12 * 1024 * 1024

# Below this total size (bytes) we never add extra grid steps just for
# megacore parallelism: each step costs ~0.35 us of overhead.
_MIN_SPLIT_BYTES = 1 << 19  # 512 KiB


def _sublane(dtype):
    # Sublane granularity for the second-to-last block dim:
    # 8 for 32-bit, 16 for 16-bit, 32 for 8-bit dtypes.
    return 8 * (4 // jnp.dtype(dtype).itemsize)


def _largest_aligned_divisor(width, target, align=128):
    """Largest d with d % align == 0, width % d == 0, d <= target.

    Assumes width % align == 0 (so align itself always qualifies).
    """
    k = width // align
    best = 1
    i = 1
    while i * i <= k:
        if k % i == 0:
            for cand in (i, k // i):
                d = align * cand
                if d <= target and cand > best:
                    best = cand
        i += 1
    return align * best


def _choose_tiles(rows, width, dtype):
    """Tile sizes for the (rows, width) replicate-copy fast path.

    Keeps the full (contiguous) row width unless even one sublane group of
    rows would exceed the VMEM budget; only then splits the lane axis into a
    128-aligned divisor of `width`.
    """
    itemsize = jnp.dtype(dtype).itemsize
    sub = _sublane(dtype)
    per_elem = (2 + 4) * 2 * itemsize  # 2 reads + 4 writes, double-buffered

    min_rows = sub if rows > 1 else 1  # sublane-aligned blocks when splitting rows
    tile_w = width
    if width % 128 == 0 and min_rows * width * per_elem > _VMEM_BUDGET:
        target_w = max(128, (_VMEM_BUDGET // (min_rows * per_elem)) // 128 * 128)
        tile_w = _largest_aligned_divisor(width, target_w)
    # TODO(synk): if width is not 128-aligned AND a single row exceeds VMEM
    # (never happens for this module's shapes), the lane axis is not split.

    tile_r = max(min_rows, _VMEM_BUDGET // max(1, tile_w * per_elem))
    tile_r = min(tile_r, rows)
    if tile_r < rows:
        tile_r = max(sub, (tile_r // sub) * sub)
        tile_r = min(tile_r, rows)
    return tile_r, tile_w


def _ensure_two_steps(rows, width, tile_r, tile_w, dtype):
    """If the copy is non-trivial and the grid collapsed to one step, split so
    both of v7x's TensorCores get work (each streams ~half the HBM traffic)."""
    itemsize = jnp.dtype(dtype).itemsize
    sub = _sublane(dtype)
    if rows * width * itemsize < _MIN_SPLIT_BYTES:
        return tile_r, tile_w
    if pl.cdiv(rows, tile_r) * pl.cdiv(width, tile_w) >= 2:
        return tile_r, tile_w
    if rows >= 2 * sub:
        half = ((rows + 1) // 2 + sub - 1) // sub * sub
        return min(rows, half), tile_w
    if tile_w % 256 == 0:
        return tile_r, tile_w // 2
    return tile_r, tile_w


def _replicate_cat_kernel(p_ref, h_ref, o_ref):
    """kernel_size==1/stride==1 fast path: avg = max = identity, so the fused
    pool+cat is four contiguous block copies per grid step."""
    p = p_ref[...]
    h = h_ref[...]
    o_ref[0] = p  # premise avg-pool    (identity)
    o_ref[1] = p  # premise max-pool    (identity)
    o_ref[2] = h  # hypotheses avg-pool (identity)
    o_ref[3] = h  # hypotheses max-pool (identity)


def _pooling_identity(premise, hypotheses):
    n, c, l = premise.shape
    f = c * l
    t = n * f
    dtype = premise.dtype
    itemsize = jnp.dtype(dtype).itemsize

    # Pick a lane-dense, row-major 2-D view of the flat data. Any
    # (rows, width) factorisation of N*C*L is valid: the fused pool+cat is a
    # pure replicate-copy and the final (4, rows, width) -> (4N, C, L) reshape
    # is metadata-only in row-major order.
    if f >= 128 and f % 128 == 0:
        rows, width = n, f
    elif t % 128 == 0:
        width = _largest_aligned_divisor(t, 16384)
        rows = t // width
    else:
        # TODO(synk): total element count not 128-alignable without padding;
        # output stores on this rare fallback are masked (vst.msk).
        rows, width = n, f

    p2 = premise.reshape(rows, width)
    h2 = hypotheses.reshape(rows, width)

    tile_r, tile_w = _choose_tiles(rows, width, dtype)
    tile_r, tile_w = _ensure_two_steps(rows, width, tile_r, tile_w, dtype)
    grid = (pl.cdiv(rows, tile_r), pl.cdiv(width, tile_w))
    bytes_accessed = (2 + 4) * t * itemsize  # read 2x, write 4x

    out = pl.pallas_call(
        _replicate_cat_kernel,
        out_shape=jax.ShapeDtypeStruct((4, rows, width), dtype),
        grid=grid,
        in_specs=[
            pl.BlockSpec((tile_r, tile_w), lambda i, j: (i, j)),
            pl.BlockSpec((tile_r, tile_w), lambda i, j: (i, j)),
        ],
        out_specs=pl.BlockSpec((4, tile_r, tile_w), lambda i, j: (0, i, j)),
        compiler_params=pltpu.CompilerParams(
            dimension_semantics=("parallel", "parallel"),
        ),
        cost_estimate=pl.CostEstimate(
            flops=0, transcendentals=0, bytes_accessed=bytes_accessed
        ),
    )(p2, h2)

    # Row-major metadata-only reshape: (4, rows, width) -> (4N, C, L)
    # == torch.cat((p, p, h, h), dim=0) for the identity pooling.
    return out.reshape(4 * n, c, l)


def _pool_cat_kernel(p_ref, h_ref, o_ref, *, kernel_size, stride, l_out):
    """General path: fused single-pass avg (f32 accumulation) + max pooling
    over the last axis, then write the dim-0 concatenation."""

    def pool1d(x):
        # x: (tile_n, tile_c, L)
        # TODO(synk): stride > 1 uses a lane-strided slice (cross-lane
        # relayout); correct but not memcpy-class perf. The module only ever
        # uses stride == 1.
        def window(k):
            if stride > 1:
                return x[:, :, k : k + stride * l_out : stride]
            return x[:, :, k : k + l_out]

        w = window(0)
        acc = w.astype(jnp.float32)
        mx = w
        for k in range(1, kernel_size):
            w = window(k)
            acc = acc + w.astype(jnp.float32)
            mx = jnp.maximum(mx, w)
        avg = (acc / kernel_size).astype(x.dtype)
        return avg, mx

    p_avg, p_max = pool1d(p_ref[...])
    h_avg, h_max = pool1d(h_ref[...])
    o_ref[0] = p_avg
    o_ref[1] = p_max
    o_ref[2] = h_avg
    o_ref[3] = h_max


def _pooling_general(premise, hypotheses, kernel_size, stride):
    n, c, l = premise.shape
    l_out = (l - kernel_size) // stride + 1
    dtype = premise.dtype
    itemsize = jnp.dtype(dtype).itemsize
    sub = _sublane(dtype)

    # Working set per (1 batch, 1 channel), double-buffered:
    #   2 input rows of L + 4 output rows of L_out.
    per_chan = 2 * (2 * l + 4 * l_out) * itemsize

    # Split channels when one full batch row would exceed the VMEM budget
    # (pooling is per-channel, so C-tiling is semantics-free).
    tile_c = c
    if c * per_chan > _VMEM_BUDGET:
        tile_c = max(1, _VMEM_BUDGET // per_chan)
        if tile_c < c:
            tile_c = max(sub, (tile_c // sub) * sub)  # keep sublane-aligned blocks
        tile_c = min(tile_c, c)
        # TODO(synk): if even `sub` channels of length L exceed VMEM, L-tiling
        # with halo windows would be needed; not required for this module.

    tile_n = min(n, max(1, _VMEM_BUDGET // (tile_c * per_chan)))

    # Give v7x's second TensorCore work when the grid would be a single step.
    if (tile_n == n and tile_c == c and n >= 2
            and n * c * l * itemsize >= _MIN_SPLIT_BYTES):
        tile_n = pl.cdiv(n, 2)

    grid = (pl.cdiv(n, tile_n), pl.cdiv(c, tile_c))

    kernel = functools.partial(
        _pool_cat_kernel, kernel_size=kernel_size, stride=stride, l_out=l_out
    )
    bytes_accessed = (2 * c * l + 4 * c * l_out) * n * itemsize
    flops = 2 * 2 * kernel_size * n * c * l_out  # sum + max, both inputs

    # TODO(synk): l_out is typically not a multiple of 128, so output stores
    # on this (unused-by-the-module) path are masked vst; acceptable here.
    out = pl.pallas_call(
        kernel,
        out_shape=jax.ShapeDtypeStruct((4, n, c, l_out), dtype),
        grid=grid,
        in_specs=[
            pl.BlockSpec((tile_n, tile_c, l), lambda i, j: (i, j, 0)),
            pl.BlockSpec((tile_n, tile_c, l), lambda i, j: (i, j, 0)),
        ],
        out_specs=pl.BlockSpec(
            (4, tile_n, tile_c, l_out), lambda i, j: (0, i, j, 0)
        ),
        compiler_params=pltpu.CompilerParams(
            dimension_semantics=("parallel", "parallel"),
        ),
        cost_estimate=pl.CostEstimate(
            flops=flops, transcendentals=0, bytes_accessed=bytes_accessed
        ),
    )(premise, hypotheses)

    return out.reshape(4 * n, c, l_out)


def pooling_forward(premise, hypotheses, *, kernel_size=1, stride=1):
    """Pallas equivalent of Pooling.forward(premise, hypotheses).

    premise, hypotheses: (N, C, L) arrays of identical shape/dtype.
    Returns (4*N, C, L_out), L_out = (L - kernel_size)//stride + 1, equal to
    torch.cat((avg(p), max(p), avg(h), max(h)), dim=0).
    """
    assert premise.shape == hypotheses.shape
    assert premise.dtype == hypotheses.dtype
    if kernel_size == 1 and stride == 1:
        return _pooling_identity(premise, hypotheses)
    return _pooling_general(premise, hypotheses, kernel_size, stride)


if __name__ == "__main__":
    key = jax.random.PRNGKey(0)
    k1, k2 = jax.random.split(key)

    # Small NCL shapes: batch=2, channels=4, seq_len=16.
    n, c, l = 2, 4, 16
    premise = jax.random.normal(k1, (n, c, l), dtype=jnp.float32)
    hypotheses = jax.random.normal(k2, (n, c, l), dtype=jnp.float32)

    # --- Module configuration: AvgPool1d(1,1)/MaxPool1d(1,1) are identity. ---
    out = jax.block_until_ready(pooling_forward(premise, hypotheses))
    ref = jnp.concatenate([premise, premise, hypotheses, hypotheses], axis=0)
    assert out.shape == ref.shape, (out.shape, ref.shape)
    assert jnp.allclose(out, ref, atol=1e-6), "fast-path mismatch vs reference"

    # --- General-path sanity check (kernel_size=2, stride=1). ---
    def ref_pool(x, ks, st):
        lo = (x.shape[-1] - ks) // st + 1
        wins = jnp.stack(
            [x[:, :, k : k + st * lo : st] for k in range(ks)], axis=-1
        )
        return wins.mean(-1), wins.max(-1)

    out2 = jax.block_until_ready(
        pooling_forward(premise, hypotheses, kernel_size=2, stride=1)
    )
    pa, pm = ref_pool(premise, 2, 1)
    ha, hm = ref_pool(hypotheses, 2, 1)
    ref2 = jnp.concatenate([pa, pm, ha, hm], axis=0)
    assert out2.shape == ref2.shape, (out2.shape, ref2.shape)
    assert jnp.allclose(out2, ref2, atol=1e-5), "general-path mismatch vs ref"

    print("KERNEL_OK")
</pallas_src>

<mosaic_0001>
module attributes {stable_mosaic.version = 11 : i64} {
  func.func @_replicate_cat_kernel(%arg0: i32, %arg1: i32, %arg2: memref<1x128xf32, #tpu.memory_space<vmem>>, %arg3: memref<1x128xf32, #tpu.memory_space<vmem>>, %arg4: memref<4x1x128xf32, #tpu.memory_space<vmem>>) attributes {dimension_semantics = [#tpu.dimension_semantics<parallel>, #tpu.dimension_semantics<parallel>], iteration_bounds = array<i64: 1, 1>, scalar_prefetch = 0 : i64, scratch_operands = 0 : i64, tpu.core_type = #tpu.core_type<tc>, window_params = [{transform_indices = @transform_0, window_bounds = array<i64: 1, 128>}, {transform_indices = @transform_1, window_bounds = array<i64: 1, 128>}, {transform_indices = @transform_2, window_bounds = array<i64: 4, 1, 128>}]} {
    %c0 = arith.constant 0 : index
    %c0_0 = arith.constant 0 : index
    %0 = vector.load %arg2[%c0, %c0_0] : memref<1x128xf32, #tpu.memory_space<vmem>>, vector<1x128xf32>
    %c0_1 = arith.constant 0 : index
    %c0_2 = arith.constant 0 : index
    %1 = vector.load %arg3[%c0_1, %c0_2] : memref<1x128xf32, #tpu.memory_space<vmem>>, vector<1x128xf32>
    %c0_3 = arith.constant 0 : index
    %c0_4 = arith.constant 0 : index
    %c0_5 = arith.constant 0 : index
    %2 = vector.load %arg4[%c0_3, %c0_4, %c0_5] : memref<4x1x128xf32, #tpu.memory_space<vmem>>, vector<1x1x128xf32>
    %3 = vector.shape_cast %2 : vector<1x1x128xf32> to vector<1x128xf32>
    %4 = vector.shape_cast %0 : vector<1x128xf32> to vector<1x1x128xf32>
    tpu.vector_store %arg4[%c0_3, %c0_4, %c0_5], %4 {strides = array<i32>} : memref<4x1x128xf32, #tpu.memory_space<vmem>>, vector<1x1x128xf32>,
    %c1 = arith.constant 1 : index
    %c0_6 = arith.constant 0 : index
    %c0_7 = arith.constant 0 : index
    %5 = vector.load %arg4[%c1, %c0_6, %c0_7] : memref<4x1x128xf32, #tpu.memory_space<vmem>>, vector<1x1x128xf32>
    %6 = vector.shape_cast %5 : vector<1x1x128xf32> to vector<1x128xf32>
    %7 = vector.shape_cast %0 : vector<1x128xf32> to vector<1x1x128xf32>
    tpu.vector_store %arg4[%c1, %c0_6, %c0_7], %7 {strides = array<i32>} : memref<4x1x128xf32, #tpu.memory_space<vmem>>, vector<1x1x128xf32>,
    %c2 = arith.constant 2 : index
    %c0_8 = arith.constant 0 : index
    %c0_9 = arith.constant 0 : index
    %8 = vector.load %arg4[%c2, %c0_8, %c0_9] : memref<4x1x128xf32, #tpu.memory_space<vmem>>, vector<1x1x128xf32>
    %9 = vector.shape_cast %8 : vector<1x1x128xf32> to vector<1x128xf32>
    %10 = vector.shape_cast %1 : vector<1x128xf32> to vector<1x1x128xf32>
    tpu.vector_store %arg4[%c2, %c0_8, %c0_9], %10 {strides = array<i32>} : memref<4x1x128xf32, #tpu.memory_space<vmem>>, vector<1x1x128xf32>,
    %c3 = arith.constant 3 : index
    %c0_10 = arith.constant 0 : index
    %c0_11 = arith.constant 0 : index
    %11 = vector.load %arg4[%c3, %c0_10, %c0_11] : memref<4x1x128xf32, #tpu.memory_space<vmem>>, vector<1x1x128xf32>
    %12 = vector.shape_cast %11 : vector<1x1x128xf32> to vector<1x128xf32>
    %13 = vector.shape_cast %1 : vector<1x128xf32> to vector<1x1x128xf32>
    tpu.vector_store %arg4[%c3, %c0_10, %c0_11], %13 {strides = array<i32>} : memref<4x1x128xf32, #tpu.memory_space<vmem>>, vector<1x1x128xf32>,
    return
  }
  func.func @transform_0(%arg0: i32, %arg1: i32) -> (i32, i32) {
    %c0_i32 = arith.constant 0 : i32
    return %arg0, %arg1 : i32, i32
  }
  func.func @transform_1(%arg0: i32, %arg1: i32) -> (i32, i32) {
    %c0_i32 = arith.constant 0 : i32
    return %arg0, %arg1 : i32, i32
  }
  func.func @transform_2(%arg0: i32, %arg1: i32) -> (i32, i32, i32) {
    %c0_i32 = arith.constant 0 : i32
    %c0_i32_0 = arith.constant 0 : i32
    return %c0_i32, %arg0, %arg1 : i32, i32, i32
  }
}

</mosaic_0001>

<bundles_post_ra>
// kernel: tpu_custom_call.1
= control target key start
LH: loop header
LB: loop body
LE: loop exit
PB: predicated region body
PF: predicated region fallthrough
CT: control target
= control target key end

     0   :  { %7 = vsyncpa [#allocation3], 0  ;;  %s181_s0 = inlined_call_operand.hbm [shape: f32[1,128], index: 0, kind: input, shape index: {}]   ;;  %s182_s1 = inlined_call_operand.hbm [shape: f32[1,128], index: 1, kind: input, shape index: {}]   ;;  %s183_s2 = inlined_call_operand.hbm [shape: f32[4,1,128], index: 2, kind: output, shape index: {}]  }
   0x1   :  { %8 = vsyncpa [#allocation6], 0 }
   0x2   :  { %9 = vsyncpa [#allocation4], 0  ;;  %s15_s11 = sshll.u32 %s181_s0, 4  ;;  %s152_s12 = smov [#allocation2]   ;;  %s16_s11 = int_to_ptr.hbm [resolvable:$true] %s15_s11 }
   0x3   :  { %s17_s13 = sshll.u32 %s152_s12, 4  ;;  %s26_s16 = sshll.u32 %s182_s1, 4  ;;  %s18_s13 = int_to_ptr.vmem [resolvable:$true] %s17_s13  ;;  %s27_s16 = int_to_ptr.hbm [resolvable:$true] %s26_s16 }
   0x4   :  { %20 = dma.hbm_to_vmem [thread:$0]  %s16_s11, 16, %s18_s13, [#allocation3]  }
   0x5   :  { %s153_s17 = smov [#allocation5]  }
   0x6   :  { %s28_s18 = sshll.u32 %s153_s17, 4  ;;  %s29_s18 = int_to_ptr.vmem [resolvable:$true] %s28_s18 }
   0x7   :  { %31 = dma.hbm_to_vmem [thread:$0]  %s27_s16, 16, %s29_s18, [#allocation6]  }
   0x8   :  { %146 = dma.done.wait [#allocation3], 16  }
   0x9   :  { %147 = vsyncadd [#allocation3], 4294967280 }
   0xa   :  { %148 = dma.done.wait [#allocation6], 16  }
   0xb   :  { %149 = vsyncadd [#allocation6], 4294967280  ;;  %s154_s19 = smov [#allocation7]   ;;  %s55_s22 = sshll.u32 %s183_s2, 4  ;;  %v40_v0 = vld [vmem:[#allocation2] sm:$0x1]  ;;  %s56_s22 = int_to_ptr.hbm [resolvable:$true] %s55_s22 }
   0xc   :  { %s53_s0 = sshll.u32 %s154_s19, 4  ;;  %v41_v1 = vld [vmem:[#allocation5] sm:$0x1]  ;;  %42 = vst [vmem:[#allocation7] sm:$0x1] %v40_v0  ;;  %s155_s1 = smov 16   ;;  %s54_s0 = int_to_ptr.vmem [resolvable:$true] %s53_s0 }
   0xd   :  { %44 = vst [vmem:[#allocation7 + $0x1] sm:$0x1] %v40_v0  ;;  %s156_s23 = smov 1  }
   0xe   :  { %46 = vst [vmem:[#allocation7 + $0x2] sm:$0x1] %v41_v1 }
   0xf   :  { %48 = vst [vmem:[#allocation7 + $0x3] sm:$0x1] %v41_v1 }
  0x10   :  { %61 = dma.vmem_to_hbm [thread:$0]  %s54_s0, 64, %s56_s22, [#allocation4], %s155_s1, %s155_s1, %s156_s23  }
  0x11   :  { %150 = dma.done.wait [#allocation4], 64  }
  0x12   :  { %151 = vsyncadd [#allocation4], 4294967232 }
  0x13   :  { %66 = vsyncpa [#allocation3], 1 }
  0x14   :  { %67 = vsyncpa [#allocation6], 1 }
  0x15   :  { %68 = vsyncpa [#allocation4], 1 }

</bundles_post_ra>
